<compile_context>
chip_gen: v7x
topology: tpu7x:2x2x1
jax: 0.10.0
libtpu: 0.0.40
codegen_flags: <defaults>
</compile_context>

<pallas_src>
import jax
import jax.numpy as jnp
from jax import lax
from jax.experimental import pallas as pl
from jax.experimental.pallas import tpu as pltpu

HEAD_PAD = 128   # lane-padded width of the fused-head GEMM output (compute only)
OUT_W = 10       # live output columns: 3 center + 3 size + 4 quat


def box_decoder_kernel(x_ref, wmlp_ref, bmlp_ref, wfused_ref, bfused_ref,
                       sone_ref, o_ref):
    x = x_ref[...]                                            # [TB, F] f32

    # feat = leaky_relu(mlp(x)), negative_slope = 0.01 (PyTorch default).
    feat = jnp.dot(x, wmlp_ref[...],
                   preferred_element_type=jnp.float32) + bmlp_ref[...]
    feat = jnp.where(feat >= 0, feat, 0.01 * feat)            # [TB, H]

    # Single fused head GEMM over [x | feat]  (K = F+H, N = 128 lane-padded).
    # Column layout: 0:3 center, 3:6 size (weights pre-scaled by 0.5 at init),
    # 6:10 quat (b_fused carries the +[1,0,0,0] offset), 10:128 exact zeros.
    xf = jnp.concatenate([x, feat], axis=-1)                  # [TB, F+H]
    pre = jnp.dot(xf, wfused_ref[...],
                  preferred_element_type=jnp.float32) + bfused_ref[...]

    col = lax.broadcasted_iota(jnp.int32, pre.shape, 1)
    is_cs = col < 6                                           # center+size lanes

    t = jnp.tanh(pre)                  # one tanh: center = t, size = 1 + t
    sumsq = jnp.sum(jnp.where(is_cs, 0.0, pre * pre), axis=1, keepdims=True)
    quat = pre * lax.rsqrt(sumsq + 1e-24)                     # EUP rsqrt, no divide

    out = jnp.where(is_cs, t, quat) + sone_ref[...]           # +1 on size cols 3:6
    o_ref[...] = out[:, :OUT_W]                               # store live cols only


def box_decoder(parent_feature, params, *, tile_b=1024):
    """parent_feature: [B, F] f32. Returns [B, 10] f32."""
    B, F = parent_feature.shape
    H = params["w_mlp"].shape[1]

    # Batch tile: multiple of 8 (f32 sublanes). For B > 8 aim for >= 2 grid
    # steps so the "parallel" batch axis can shard across both TCs on v7x.
    if B <= 8:
        tb = B                              # single block == full array, no padding
    else:
        half = ((B + 1) // 2 + 7) // 8 * 8  # ~ceil(B/2), rounded up to 8
        tb = max(8, min(tile_b, half))
    n_steps = pl.cdiv(B, tb)                # ragged last block handled by Pallas

    # Right-sized VMEM request: resident weights + double-buffered x/out tiles
    # + generous slack for compute intermediates.
    weights_b = (F * H + H + (F + H) * HEAD_PAD + 2 * HEAD_PAD) * 4
    io_b = 2 * tb * (F + OUT_W) * 4
    scratch_b = 8 * tb * HEAD_PAD * 4
    vmem_limit = int(min(64 << 20, max(8 << 20, 2 * (weights_b + io_b + scratch_b))))

    out = pl.pallas_call(
        box_decoder_kernel,
        out_shape=jax.ShapeDtypeStruct((B, OUT_W), jnp.float32),
        grid_spec=pltpu.PrefetchScalarGridSpec(
            num_scalar_prefetch=0,
            grid=(n_steps,),
            in_specs=[
                pl.BlockSpec((tb, F), lambda i: (i, 0)),            # x tile
                pl.BlockSpec((F, H), lambda i: (0, 0)),             # w_mlp (resident)
                pl.BlockSpec((1, H), lambda i: (0, 0)),             # b_mlp
                pl.BlockSpec((F + H, HEAD_PAD), lambda i: (0, 0)),  # fused [skip;head] W
                pl.BlockSpec((1, HEAD_PAD), lambda i: (0, 0)),      # fused bias
                pl.BlockSpec((1, HEAD_PAD), lambda i: (0, 0)),      # size +1 one-hot
            ],
            out_specs=pl.BlockSpec((tb, OUT_W), lambda i: (i, 0)),
        ),
        compiler_params=pltpu.CompilerParams(
            dimension_semantics=("parallel",),
            vmem_limit_bytes=vmem_limit,
        ),
    )(parent_feature, params["w_mlp"], params["b_mlp"],
      params["w_fused"], params["b_fused"], params["size_one"])

    return out


def init_params(key, feature_size, hidden_size):
    """Deterministic synthetic init (shapes match the PyTorch module).

    Weights are stored pre-transposed as [in, out]. The skip and head linears
    of the three output heads are stacked into one fused [F+H, 10] weight,
    zero-padded to 128 lanes. The 0.5 scale of the size head (from the
    2*sigmoid == 1 + tanh(x/2) identity) is folded into columns 3:6 of the
    fused weight/bias, and the quat +[1,0,0,0] offset is folded into the bias.
    """
    ks = jax.random.split(key, 14)

    def lin(kw, kb, fan_in, fan_out):
        bound = 1.0 / jnp.sqrt(fan_in)
        w = jax.random.uniform(kw, (fan_in, fan_out), jnp.float32, -bound, bound)
        b = jax.random.uniform(kb, (1, fan_out), jnp.float32, -bound, bound)
        return w, b

    w_mlp, b_mlp = lin(ks[0], ks[1], feature_size, hidden_size)
    w_c, b_c = lin(ks[2], ks[3], hidden_size, 3)
    w_s, b_s = lin(ks[4], ks[5], hidden_size, 3)
    w_q, b_q = lin(ks[6], ks[7], hidden_size, 4)
    w_cs, b_cs = lin(ks[8], ks[9], feature_size, 3)
    w_ss, b_ss = lin(ks[10], ks[11], feature_size, 3)
    w_qs, b_qs = lin(ks[12], ks[13], feature_size, 4)

    w_head = jnp.concatenate([w_c, w_s, w_q], axis=1)        # [H, 10]
    b_head = jnp.concatenate([b_c, b_s, b_q], axis=1)        # [1, 10]
    w_skip = jnp.concatenate([w_cs, w_ss, w_qs], axis=1)     # [F, 10]
    b_skip = jnp.concatenate([b_cs, b_ss, b_qs], axis=1)     # [1, 10]

    # Fold the 0.5 size scale (cols 3:6 only) into the fused weights/bias.
    scale = jnp.array([1, 1, 1, 0.5, 0.5, 0.5, 1, 1, 1, 1], jnp.float32)
    quat_off = jnp.zeros((1, 10), jnp.float32).at[0, 6].set(1.0)

    w_fused = jnp.concatenate([w_skip * scale, w_head * scale], axis=0)  # [F+H, 10]
    b_fused = (b_skip + b_head) * scale + quat_off                       # [1, 10]

    pad = HEAD_PAD - 10
    size_one = jnp.zeros((1, HEAD_PAD), jnp.float32).at[0, 3:6].set(1.0)

    params = {
        "w_mlp": w_mlp,
        "b_mlp": b_mlp,
        "w_fused": jnp.pad(w_fused, ((0, 0), (0, pad))),     # [F+H, 128]
        "b_fused": jnp.pad(b_fused, ((0, 0), (0, pad))),     # [1, 128]
        "size_one": size_one,                                # [1, 128]
        # raw (unfused) params kept only for the pure-JAX reference
        "_raw": {"w_mlp": w_mlp, "b_mlp": b_mlp,
                 "w_head": w_head, "b_head": b_head,
                 "w_skip": w_skip, "b_skip": b_skip},
    }
    return params


def box_decoder_ref(x, params):
    """Pure-JAX reference matching the original PyTorch module exactly."""
    p = params["_raw"]
    feat = x @ p["w_mlp"] + p["b_mlp"]
    feat = jnp.where(feat >= 0, feat, 0.01 * feat)
    pre = x @ p["w_skip"] + p["b_skip"] + feat @ p["w_head"] + p["b_head"]
    center = jnp.tanh(pre[:, 0:3])
    size = jax.nn.sigmoid(pre[:, 3:6]) * 2.0
    quat = pre[:, 6:10] + jnp.array([[1.0, 0.0, 0.0, 0.0]], jnp.float32)
    quat = quat / (1e-12 + jnp.sqrt(jnp.sum(quat ** 2, axis=1, keepdims=True)))
    return jnp.concatenate([center, size, quat], axis=1)


if __name__ == "__main__":
    B, FEATURE, HIDDEN = 2, 32, 32
    key = jax.random.PRNGKey(0)
    k_x, k_p = jax.random.split(key)

    x = jax.random.normal(k_x, (B, FEATURE), jnp.float32)
    params = init_params(k_p, FEATURE, HIDDEN)

    out = jax.block_until_ready(box_decoder(x, params))
    ref = box_decoder_ref(x, params)

    assert out.shape == (B, 10)
    assert jnp.allclose(out, ref, atol=5e-5, rtol=5e-5)
    print("KERNEL_OK")
</pallas_src>

<mosaic_0001>
module attributes {stable_mosaic.version = 11 : i64} {
  func.func @box_decoder_kernel(%arg0: i32, %arg1: memref<2x32xf32, #tpu.memory_space<vmem>>, %arg2: memref<32x32xf32, #tpu.memory_space<vmem>>, %arg3: memref<1x32xf32, #tpu.memory_space<vmem>>, %arg4: memref<64x128xf32, #tpu.memory_space<vmem>>, %arg5: memref<1x128xf32, #tpu.memory_space<vmem>>, %arg6: memref<1x128xf32, #tpu.memory_space<vmem>>, %arg7: memref<2x10xf32, #tpu.memory_space<vmem>>) attributes {dimension_semantics = [#tpu.dimension_semantics<parallel>], iteration_bounds = array<i64: 1>, scalar_prefetch = 0 : i64, scratch_operands = 0 : i64, tpu.core_type = #tpu.core_type<tc>, window_params = [{transform_indices = @transform_0, window_bounds = array<i64: 2, 32>}, {pipeline_mode = #tpu.pipeline_mode<synchronous>, transform_indices = @transform_1, window_bounds = array<i64: 32, 32>}, {pipeline_mode = #tpu.pipeline_mode<synchronous>, transform_indices = @transform_2, window_bounds = array<i64: 1, 32>}, {pipeline_mode = #tpu.pipeline_mode<synchronous>, transform_indices = @transform_3, window_bounds = array<i64: 64, 128>}, {pipeline_mode = #tpu.pipeline_mode<synchronous>, transform_indices = @transform_4, window_bounds = array<i64: 1, 128>}, {pipeline_mode = #tpu.pipeline_mode<synchronous>, transform_indices = @transform_5, window_bounds = array<i64: 1, 128>}, {transform_indices = @transform_6, window_bounds = array<i64: 2, 10>}]} {
    %c0 = arith.constant 0 : index
    %c0_0 = arith.constant 0 : index
    %0 = vector.load %arg1[%c0, %c0_0] : memref<2x32xf32, #tpu.memory_space<vmem>>, vector<2x32xf32>
    %c0_1 = arith.constant 0 : index
    %c0_2 = arith.constant 0 : index
    %1 = vector.load %arg2[%c0_1, %c0_2] : memref<32x32xf32, #tpu.memory_space<vmem>>, vector<32x32xf32>
    %cst = arith.constant dense<0.000000e+00> : vector<2x32xf32>
    %2 = tpu.matmul %0, %1, %cst {dimension_numbers = #tpu.dot_dimension_numbers<[1], [0], [0], [1], [0, 0, 1, 1], [], []>} : vector<2x32xf32>, vector<32x32xf32>, vector<2x32xf32> -> vector<2x32xf32>
    %c0_3 = arith.constant 0 : index
    %c0_4 = arith.constant 0 : index
    %3 = vector.load %arg3[%c0_3, %c0_4] : memref<1x32xf32, #tpu.memory_space<vmem>>, vector<1x32xf32>
    %4 = vector.broadcast %3 : vector<1x32xf32> to vector<2x32xf32>
    %5 = arith.addf %2, %4 : vector<2x32xf32>
    %cst_5 = arith.constant 0.000000e+00 : f32
    %6 = vector.broadcast %cst_5 : f32 to vector<2x32xf32>
    %7 = arith.cmpf oge, %5, %6 : vector<2x32xf32>
    %cst_6 = arith.constant 0.00999999977 : f32
    %8 = vector.broadcast %cst_6 : f32 to vector<2x32xf32>
    %9 = arith.mulf %8, %5 : vector<2x32xf32>
    %10 = arith.select %7, %5, %9 : vector<2x32xi1>, vector<2x32xf32>
    %11 = tpu.concatenate %0, %10 in 1 : vector<2x32xf32>, vector<2x32xf32> -> vector<2x64xf32>
    %c0_7 = arith.constant 0 : index
    %c0_8 = arith.constant 0 : index
    %12 = vector.load %arg4[%c0_7, %c0_8] : memref<64x128xf32, #tpu.memory_space<vmem>>, vector<64x128xf32>
    %cst_9 = arith.constant dense<0.000000e+00> : vector<2x128xf32>
    %13 = tpu.matmul %11, %12, %cst_9 {dimension_numbers = #tpu.dot_dimension_numbers<[1], [0], [0], [1], [0, 0, 1, 1], [], []>} : vector<2x64xf32>, vector<64x128xf32>, vector<2x128xf32> -> vector<2x128xf32>
    %c0_10 = arith.constant 0 : index
    %c0_11 = arith.constant 0 : index
    %14 = vector.load %arg5[%c0_10, %c0_11] : memref<1x128xf32, #tpu.memory_space<vmem>>, vector<1x128xf32>
    %15 = vector.broadcast %14 : vector<1x128xf32> to vector<2x128xf32>
    %16 = arith.addf %13, %15 : vector<2x128xf32>
    %17 = tpu.iota {dimensions = array<i32: 1>} : vector<2x128xi32>
    %c6_i32 = arith.constant 6 : i32
    %18 = vector.broadcast %c6_i32 : i32 to vector<2x128xi32>
    %19 = arith.cmpi slt, %17, %18 : vector<2x128xi32>
    %20 = math.tanh %16 : vector<2x128xf32>
    %21 = arith.mulf %16, %16 : vector<2x128xf32>
    %cst_12 = arith.constant 0.000000e+00 : f32
    %22 = vector.broadcast %cst_12 : f32 to vector<2x128xf32>
    %23 = arith.select %19, %22, %21 : vector<2x128xi1>, vector<2x128xf32>
    %cst_13 = arith.constant dense<0.000000e+00> : vector<2xf32>
    %24 = vector.multi_reduction <add>, %23, %cst_13 [1] : vector<2x128xf32> to vector<2xf32>
    %25 = vector.shape_cast %24 : vector<2xf32> to vector<2x1xf32>
    %cst_14 = arith.constant 1.000000e-24 : f32
    %26 = vector.broadcast %cst_14 : f32 to vector<2x1xf32>
    %27 = arith.addf %25, %26 : vector<2x1xf32>
    %28 = math.rsqrt %27 : vector<2x1xf32>
    %29 = vector.broadcast %28 : vector<2x1xf32> to vector<2x128xf32>
    %30 = arith.mulf %16, %29 : vector<2x128xf32>
    %31 = arith.select %19, %20, %30 : vector<2x128xi1>, vector<2x128xf32>
    %c0_15 = arith.constant 0 : index
    %c0_16 = arith.constant 0 : index
    %32 = vector.load %arg6[%c0_15, %c0_16] : memref<1x128xf32, #tpu.memory_space<vmem>>, vector<1x128xf32>
    %33 = vector.broadcast %32 : vector<1x128xf32> to vector<2x128xf32>
    %34 = arith.addf %31, %33 : vector<2x128xf32>
    %35 = vector.extract_strided_slice %34 {offsets = [0, 0], sizes = [2, 10], strides = [1, 1]} : vector<2x128xf32> to vector<2x10xf32>
    %c0_17 = arith.constant 0 : index
    %c0_18 = arith.constant 0 : index
    %36 = vector.load %arg7[%c0_17, %c0_18] : memref<2x10xf32, #tpu.memory_space<vmem>>, vector<2x10xf32>
    tpu.vector_store %arg7[%c0_17, %c0_18], %35 {strides = array<i32>} : memref<2x10xf32, #tpu.memory_space<vmem>>, vector<2x10xf32>,
    return
  }
  func.func @transform_0(%arg0: i32) -> (i32, i32) {
    %c0_i32 = arith.constant 0 : i32
    %c0_i32_0 = arith.constant 0 : i32
    return %arg0, %c0_i32 : i32, i32
  }
  func.func @transform_1(%arg0: i32) -> (i32, i32) {
    %c0_i32 = arith.constant 0 : i32
    %c0_i32_0 = arith.constant 0 : i32
    %c0_i32_1 = arith.constant 0 : i32
    return %c0_i32, %c0_i32_0 : i32, i32
  }
  func.func @transform_2(%arg0: i32) -> (i32, i32) {
    %c0_i32 = arith.constant 0 : i32
    %c0_i32_0 = arith.constant 0 : i32
    %c0_i32_1 = arith.constant 0 : i32
    return %c0_i32, %c0_i32_0 : i32, i32
  }
  func.func @transform_3(%arg0: i32) -> (i32, i32) {
    %c0_i32 = arith.constant 0 : i32
    %c0_i32_0 = arith.constant 0 : i32
    %c0_i32_1 = arith.constant 0 : i32
    return %c0_i32, %c0_i32_0 : i32, i32
  }
  func.func @transform_4(%arg0: i32) -> (i32, i32) {
    %c0_i32 = arith.constant 0 : i32
    %c0_i32_0 = arith.constant 0 : i32
    %c0_i32_1 = arith.constant 0 : i32
    return %c0_i32, %c0_i32_0 : i32, i32
  }
  func.func @transform_5(%arg0: i32) -> (i32, i32) {
    %c0_i32 = arith.constant 0 : i32
    %c0_i32_0 = arith.constant 0 : i32
    %c0_i32_1 = arith.constant 0 : i32
    return %c0_i32, %c0_i32_0 : i32, i32
  }
  func.func @transform_6(%arg0: i32) -> (i32, i32) {
    %c0_i32 = arith.constant 0 : i32
    %c0_i32_0 = arith.constant 0 : i32
    return %arg0, %c0_i32 : i32, i32
  }
}

</mosaic_0001>

<bundles_post_ra>
// kernel: tpu_custom_call.1
= control target key start
LH: loop header
LB: loop body
LE: loop exit
PB: predicated region body
PF: predicated region fallthrough
CT: control target
= control target key end

     0   :  { %11 = vsyncpa [#allocation3], 0  ;;  %s573_s0 = inlined_call_operand.hbm [shape: f32[2,32], index: 0, kind: input, shape index: {}]   ;;  %s574_s1 = inlined_call_operand.hbm [shape: f32[32,32], index: 1, kind: input, shape index: {}]   ;;  %s575_s2 = inlined_call_operand.vmem [shape: f32[1,32], index: 2, kind: input, shape index: {}]   ;;  %s576_s3 = inlined_call_operand.hbm [shape: f32[64,128], index: 3, kind: input, shape index: {}]   ;;  %s577_s4 = inlined_call_operand.vmem [shape: f32[1,128], index: 4, kind: input, shape index: {}]   ;;  %s578_s5 = inlined_call_operand.vmem [shape: f32[1,128], index: 5, kind: input, shape index: {}]   ;;  %s579_s6 = inlined_call_operand.hbm [shape: f32[2,10], index: 6, kind: output, shape index: {}]  }
   0x1   :  { %12 = vsyncpa [#allocation6], 0 }
   0x2   :  { %13 = vsyncpa [#allocation4], 0  ;;  %s461_s21 = smov [#allocation5]   ;;  %s367_s25 = scalar_lea.hbm %s574_s1, 512 }
   0x3   :  { %s29_s22 = sshll.u32 %s461_s21, 4  ;;  %p368_p0 = scmp.ne.s32.totalorder %s574_s1, %s367_s25  ;;  %s30_s22 = int_to_ptr.vmem [resolvable:$true] %s29_s22 }
   0x4   :  { %p371_p1 = scmp.lt.u32.totalorder %s367_s25, %s574_s1 }
   0x6   :  { %p373_p2 = pnand %p371_p1, %p368_p0 }
   0x8   :  { %376 = shalt.err (!%p373_p2)
}
   0x9   :  { %s377_s30 = scalar_lea.vmem %s30_s22, 512  ;;  %p382_p4 = scmp.lt.s32.totalorder %s30_s22, %s30_s22 }
   0xa   :  { %p378_p3 = scmp.ne.s32.totalorder %s30_s22, %s377_s30  ;;  %p383_p5 = scmp.lt.s32.totalorder %s377_s30, %s377_s30 }
   0xc   :  { %p384_p6 = por %p383_p5, %p382_p4 }
   0xe   :  { %p385_p7 = pnand %p384_p6, %p378_p3 }
  0x10   :  { %388 = shalt.err (!%p385_p7)
}
  0x11   :  { %s462_s7 = smov 128   ;;  %s463_s8 = smov 8  }
  0x12   :  { %35 = dma.hbm_to_vmem [thread:$0]  %s574_s1, 512, %s30_s22, [#allocation6], %s462_s7, %s462_s7, %s463_s8  }
  0x13   :  { %s464_s11 = smov [#allocation2]   ;;  %s465_s13 = smov [#allocation7]  }
  0x14   :  { %s20_s12 = sshll.u32 %s464_s11, 4  ;;  %s43_s14 = sshll.u32 %s465_s13, 4  ;;  %s21_s12 = int_to_ptr.vmem [resolvable:$true] %s20_s12  ;;  %s44_s14 = int_to_ptr.vmem [resolvable:$true] %s43_s14 }
  0x15   :  { %s389_s17 = scalar_lea.hbm %s573_s0, 32 }
  0x16   :  { %p390_p8 = scmp.ne.s32.totalorder %s573_s0, %s389_s17  ;;  %p393_p9 = scmp.lt.u32.totalorder %s389_s17, %s573_s0 }
  0x18   :  { %p395_p10 = pnand %p393_p9, %p390_p8 }
  0x1a   :  { %398 = shalt.err (!%p395_p10)
}
  0x1b   :  { %s399_s1 = scalar_lea.vmem %s21_s12, 32  ;;  %p404_p12 = scmp.lt.s32.totalorder %s21_s12, %s21_s12 }
  0x1c   :  { %p400_p11 = scmp.ne.s32.totalorder %s21_s12, %s399_s1  ;;  %p405_p13 = scmp.lt.s32.totalorder %s399_s1, %s399_s1 }
  0x1e   :  { %p406_p0 = por %p405_p13, %p404_p12 }
  0x20   :  { %p407_p1 = pnand %p406_p0, %p400_p11 }
  0x22   :  { %410 = shalt.err (!%p407_p1)
}
  0x23   :  { %23 = dma.hbm_to_vmem [thread:$0]  %s573_s0, 32, %s21_s12, [#allocation3]  }
  0x24   :  { %s411_s26 = scalar_lea.hbm %s576_s3, 1024 }
  0x25   :  { %p412_p2 = scmp.ne.s32.totalorder %s576_s3, %s411_s26  ;;  %p415_p3 = scmp.lt.u32.totalorder %s411_s26, %s576_s3 }
  0x27   :  { %p417_p4 = pnand %p415_p3, %p412_p2 }
  0x29   :  { %420 = shalt.err (!%p417_p4)
}
  0x2a   :  { %s421_s9 = scalar_lea.vmem %s44_s14, 1024  ;;  %p426_p6 = scmp.lt.s32.totalorder %s44_s14, %s44_s14 }
  0x2b   :  { %p422_p5 = scmp.ne.s32.totalorder %s44_s14, %s421_s9  ;;  %p427_p7 = scmp.lt.s32.totalorder %s421_s9, %s421_s9 }
  0x2d   :  { %p428_p8 = por %p427_p7, %p426_p6 }
  0x2f   :  { %p429_p9 = pnand %p428_p8, %p422_p5 }
  0x31   :  { %432 = shalt.err (!%p429_p9)
}
  0x32   :  { %49 = dma.hbm_to_vmem [thread:$0]  %s576_s3, 1024, %s44_s14, [#allocation6], %s462_s7, %s462_s7, %s463_s8  }
  0x33   :  { %455 = dma.done.wait [#allocation3], 32  }
  0x34   :  { %456 = vsyncadd [#allocation3], 4294967264 }
  0x35   :  { %457 = dma.done.wait [#allocation6], 1536  }
  0x36   :  { %458 = vsyncadd [#allocation6], 4294965760  ;;  %v466_v0 = vmov 0.0|0.0   ;;  %vm467_vm0 = vmmov 0   ;;  %v468_v1 = vmov 0.0   ;;  %v64_v2 = vld [vmem:[#allocation5] sm:$0xff]  ;;  %v246_v29 = vlaneseq }
  0x37   :  { %335 = vmatprep.subr.bf16.mxu0 %v466_v0  ;;  %313 = vmatprep.mubr.msk.f32.mxu0 %vm467_vm0, %v468_v1  ;;  %v65_v3 = vld [vmem:[#allocation5 + $0x8] sm:$0xff]  ;;  %v66_v4 = vld [vmem:[#allocation5 + $0x10] sm:$0xff]  ;;  %v67_v6 = vld [vmem:[#allocation5 + $0x18] sm:$0xff]  ;;  %vm75_vm1 = vcmask 261120   ;;  %s469_s8 = smov 32   ;;  %vm172_vm3 = vcmask 523264  }
  0x38   :  { %341 = vmatprep.subr.bf16.mxu1 %v466_v0  ;;  %332 = vmatprep.mubr.msk.f32.mxu1 %vm467_vm0, %v468_v1  ;;  %v336_v5 = vpack.c.bf16 %v65_v3, %v64_v2  ;;  %v339_v7 = vpack.c.bf16 %v67_v6, %v66_v4  ;;  %v63_v8 = vld [vmem:[#allocation2] sm:$0x3]  ;;  %v157_v9 = vld [vmem:[#allocation7] sm:$0xff]  ;;  %v158_v10 = vld [vmem:[#allocation7 + $0x8] sm:$0xff]  ;;  %v247_v31 = vand.u32 127, %v246_v29  ;;  %vm252_vm5 = vcmask 1041408  }
  0x39   :  { %v159_v11 = vld [vmem:[#allocation7 + $0x10] sm:$0xff]  ;;  %v342_v12 = vpack.c.bf16 %v158_v10, %v157_v9  ;;  %v160_v13 = vld [vmem:[#allocation7 + $0x18] sm:$0xff]  ;;  %v161_v15 = vld [vmem:[#allocation7 + $0x20] sm:$0xff]  ;;  %vm268_vm6 = vcmask 74752  }
  0x3a   :  { %337 = vmatpush3.bf16.msra.mxu0 %v336_v5  ;;  %v345_v14 = vpack.c.bf16 %v160_v13, %v159_v11  ;;  %v162_v16 = vld [vmem:[#allocation7 + $0x28] sm:$0xff]  ;;  %v163_v18 = vld [vmem:[#allocation7 + $0x30] sm:$0xff]  ;;  %v164_v19 = vld [vmem:[#allocation7 + $0x38] sm:$0xff]  ;;  %vm248_vm4 = vcmp.lt.s32.totalorder %v247_v31, 6 }
  0x3b   :  { %338 = vmatprep.subr.bf16.mxu0 %v466_v0  ;;  %343 = vmatpush3.bf16.msra.mxu1 %v342_v12  ;;  %v348_v17 = vpack.c.bf16 %v162_v16, %v161_v15  ;;  %v351_v20 = vpack.c.bf16 %v164_v19, %v163_v18  ;;  %v286_v21 = vld [vmem:[%s575_s2] ss:$0 sm:$0xff] }
  0x3c   :  { %344 = vmatprep.subr.bf16.mxu1 %v466_v0  ;;  %v288_v30 = vld [vmem:[%s577_s4] ss:$0 sm:$0xff]  ;;  %s470_s4 = smov [#allocation8]  }
  0x3d   :  { %v290_v42 = vld [vmem:[%s578_s5] ss:$0 sm:$0xff]  ;;  %s276_s14 = sshll.u32 %s470_s4, 4  ;;  %s277_s14 = int_to_ptr.vmem [resolvable:$true] %s276_s14 }
  0x3e   :  { %340 = vmatpush3.bf16.msra.mxu0 %v339_v7  ;;  %s433_s15 = scalar_lea.vmem %s277_s14, 32  ;;  %p438_p11 = scmp.lt.s32.totalorder %s277_s14, %s277_s14 }
  0x3f   :  { %346 = vmatpush3.bf16.msra.mxu1 %v345_v14  ;;  %p434_p10 = scmp.ne.s32.totalorder %s277_s14, %s433_s15  ;;  %p439_p12 = scmp.lt.s32.totalorder %s433_s15, %s433_s15 }
  0x40   :  { %347 = vmatprep.subr.bf16.mxu1 %v466_v0 }
  0x41   :  { %314 = vmatmul.mubr.msk.f32.vlgmr.msra.gmra.mrb[0].mxu0 %vm75_vm1, %v63_v8  ;;  %p440_p13 = por %p439_p12, %p438_p11 }
  0x43   :  { %349 = vmatpush3.bf16.msra.mxu1 %v348_v17  ;;  %p441_p0 = pnand %p440_p13, %p434_p10 }
  0x44   :  { %350 = vmatprep.subr.bf16.mxu1 %v466_v0 }
  0x47   :  { %352 = vmatpush3.bf16.msra.mxu1 %v351_v20 }
 0x114   :  { %v145_v22 = vpop.f32.mrb[0].mxu0 }
 0x115   :  { %v146_v23 = vadd.f32 %v286_v21, %v145_v22  ;;  %v315_v24 = vpop.f32.mrb[1].mxu0 }
 0x117   :  { %vm149_vm2 = vcmp.ge.f32.partialorder %v146_v23, 0.0  ;;  %v150_v25 = vmul.f32 0.01, %v146_v23 }
 0x119   :  { %v151_v26 = vsel %vm149_vm2, %v146_v23, %v150_v25 }
 0x11a   :  { %153 = vrot.lane.b32.xlu0 %v151_v26, %s469_s8 }
 0x18c   :  { %v154_v27 = vpop.permute.xlu0 %153 }
 0x18d   :  { %v156_v28 = vsel %vm75_vm1, %v63_v8, %v154_v27 }
 0x18e   :  { %333 = vmatmul.mubr.msk.f32.vlgmr.msra.gmra.mrb[0].mxu1 %vm172_vm3, %v156_v28 }
 0x261   :  { %v242_v32 = vpop.f32.mrb[0].mxu1 }
 0x262   :  { %v243_v33 = vadd.f32 %v288_v30, %v242_v32  ;;  %v334_v34 = vpop.f32.mrb[1].mxu1 }
 0x264   :  { %v250_v35 = vmul.f32 %v243_v33, %v243_v33 }
 0x266   :  { %v251_v36 = vsel %vm248_vm4, 0.0, %v250_v35 }
 0x267   :  { %v253_v37 = vsel %vm252_vm5, %v251_v36, 0.0 }
 0x268   :  { %254 = vadd.xlane.f32.xlu0 %v253_v37 }
 0x2f5   :  { %v255_v38 = vpop.xlane.xlu0 %254 }
 0x2f6   :  { %v256_v39 = vadd.f32 1e-24, %v255_v38 }
 0x2f8   :  { %363 = vrsqrt.f32 %v256_v39 }
 0x2f9   :  { %365 = vtanh.f32 %v243_v33 }
 0x302   :  { %v364_v40 = vpop.eup %363 }
 0x303   :  { %v258_v41 = vmul.f32 %v364_v40, %v243_v33  ;;  %v366_v43 = vpop.eup %365 }
 0x305   :  { %v259_v44 = vsel %vm248_vm4, %v366_v43, %v258_v41 }
 0x306   :  { %v267_v45 = vadd.f32 %v290_v42, %v259_v44 }
 0x308   :  { %269 = vst.msk [vmem:[#allocation8] sm:$0x3] %vm268_vm6, %v267_v45 }
 0x309   :  { %444 = shalt.err (!%p441_p0)
}
 0x30a   :  { %s445_s5 = scalar_lea.hbm %s579_s6, 32 }
 0x30b   :  { %p446_p1 = scmp.ne.s32.totalorder %s579_s6, %s445_s5  ;;  %p449_p2 = scmp.lt.u32.totalorder %s445_s5, %s579_s6 }
 0x30d   :  { %p451_p3 = pnand %p449_p2, %p446_p1 }
 0x30f   :  { %454 = shalt.err (!%p451_p3)
}
 0x310   :  { %279 = dma.vmem_to_hbm [thread:$0]  %s277_s14, 32, %s579_s6, [#allocation4]  }
 0x311   :  { %459 = dma.done.wait [#allocation4], 32  }
 0x312   :  { %460 = vsyncadd [#allocation4], 4294967264 }
 0x313   :  { %283 = vsyncpa [#allocation3], 1 }
 0x314   :  { %284 = vsyncpa [#allocation6], 1 }
 0x315   :  { %285 = vsyncpa [#allocation4], 1 }

</bundles_post_ra>
